<compile_context>
chip_gen: v6e
topology: v6e:2x2x1
jax: 0.10.0
libtpu: 0.0.40
codegen_flags: <defaults>
</compile_context>

<pallas_src>
import functools

import jax
import jax.numpy as jnp
from jax.experimental import pallas as pl
from jax.experimental.pallas import tpu as pltpu


def _ffn_kernel(x_ref, w1_ref, w3_ref, w2_ref, o_ref, acc_ref, *, compute_dtype):
    """One (bm, dim) row tile x one tk slice of `inter`.

    h1_k = x @ w1[:, k-tile]; h3_k = x @ w3[:, k-tile]
    acc += (SiLU(h1_k) * h3_k) @ w2[k-tile, :]
    """
    k = pl.program_id(1)

    @pl.when(k == 0)
    def _():
        acc_ref[...] = jnp.zeros_like(acc_ref)

    x = x_ref[...].astype(compute_dtype)
    h1 = jnp.dot(x, w1_ref[...], preferred_element_type=jnp.float32)
    h3 = jnp.dot(x, w3_ref[...], preferred_element_type=jnp.float32)
    g = (h1 * jax.nn.sigmoid(h1)) * h3            # SiLU gate stays in f32 (v5e-safe)
    acc_ref[...] += jnp.dot(g.astype(compute_dtype), w2_ref[...],
                            preferred_element_type=jnp.float32)

    @pl.when(k == pl.num_programs(1) - 1)
    def _():
        o_ref[...] = acc_ref[...].astype(o_ref.dtype)


def _round_up(x, n):
    return (x + n - 1) // n * n


def _pick_inter_tile(inter, block_k):
    """Largest multiple of 128 that divides `inter` and is <= block_k."""
    if inter % 128 != 0:
        return inter                      # small / odd inter: single k step
    tk = min(_round_up(block_k, 128), inter)
    while inter % tk != 0:
        tk -= 128
    return tk


def feed_forward(x, w1, w2, w3, *, block_m=512, block_k=256, compute_dtype=None):
    """x: (..., dim); w1,w3: (dim, inter); w2: (inter, dim) -> (..., dim)."""
    dim = x.shape[-1]
    inter = w1.shape[1]
    assert w1.shape == (dim, inter) and w3.shape == (dim, inter)
    assert w2.shape == (inter, dim)

    if compute_dtype is None:
        compute_dtype = x.dtype
    # TODO(synk): in production store the weights in `compute_dtype` (bf16) up
    # front so these casts are no-ops rather than a per-call HBM pass.
    w1c = w1.astype(compute_dtype)
    w3c = w3.astype(compute_dtype)
    w2c = w2.astype(compute_dtype)

    lead_shape = x.shape[:-1]
    x2 = x.reshape(-1, dim)
    m = x2.shape[0]

    # --- Row (M) tiling: multiple-of-8 tile, pad + trim the ragged tail so we
    # always keep a pipelined, megacore-shardable M axis.
    bm = min(block_m, _round_up(m, 8))
    m_pad = _round_up(m, bm)
    if m_pad != m:
        x2 = jnp.pad(x2, ((0, m_pad - m), (0, 0)))
    grid_m = m_pad // bm

    # --- Reduction (inter) tiling: weight tiles stream through VMEM.
    tk = _pick_inter_tile(inter, block_k)
    grid_k = inter // tk

    # VMEM budget (double-buffered BlockSpec pipelining); clamp to 64 MiB so
    # the same config still fits v7x's per-TensorCore VMEM.
    xb = jnp.dtype(x.dtype).itemsize
    wb = jnp.dtype(compute_dtype).itemsize
    est = (2 * bm * dim * xb              # x tile (double-buffered)
           + 2 * 2 * dim * tk * wb        # w1 + w3 tiles
           + 2 * tk * dim * wb            # w2 tile
           + 2 * bm * dim * xb            # out tile
           + bm * dim * 4)                # f32 accumulator scratch
    vmem_limit = int(min(64 * 1024 * 1024, max(2 * est, 8 * 1024 * 1024)))

    cost = pl.CostEstimate(
        flops=6 * m_pad * dim * inter,
        transcendentals=m_pad * inter,
        bytes_accessed=2 * m_pad * dim * xb + 3 * dim * inter * wb,
    )

    out2 = pl.pallas_call(
        functools.partial(_ffn_kernel, compute_dtype=compute_dtype),
        grid=(grid_m, grid_k),
        in_specs=[
            pl.BlockSpec((bm, dim), lambda i, k: (i, 0)),     # activations
            pl.BlockSpec((dim, tk), lambda i, k: (0, k)),     # w1 k-slice
            pl.BlockSpec((dim, tk), lambda i, k: (0, k)),     # w3 k-slice
            pl.BlockSpec((tk, dim), lambda i, k: (k, 0)),     # w2 k-slice
        ],
        out_specs=pl.BlockSpec((bm, dim), lambda i, k: (i, 0)),
        out_shape=jax.ShapeDtypeStruct((m_pad, dim), x.dtype),
        scratch_shapes=[pltpu.VMEM((bm, dim), jnp.float32)],
        compiler_params=pltpu.CompilerParams(
            dimension_semantics=("parallel", "arbitrary"),
            vmem_limit_bytes=vmem_limit),
        cost_estimate=cost,
    )(x2, w1c, w3c, w2c)

    if m_pad != m:
        out2 = out2[:m]
    return out2.reshape(*lead_shape, dim)


def _reference(x, w1, w2, w3):
    h1 = x @ w1
    h3 = x @ w3
    return (jax.nn.silu(h1) * h3) @ w2


if __name__ == "__main__":
    # Small shapes consistent with the module: batch=2, seq=8, dim=32, inter=64.
    B, S, DIM, INTER = 2, 8, 32, 64
    INIT_SCALE = 0.02

    key = jax.random.PRNGKey(0)
    kx, k1, k2, k3 = jax.random.split(key, 4)
    x = jax.random.normal(kx, (B, S, DIM), jnp.float32)
    # Weights stored (in_features, out_features): y = x @ W.
    w1 = jax.random.normal(k1, (DIM, INTER), jnp.float32) * INIT_SCALE
    w2 = jax.random.normal(k2, (INTER, DIM), jnp.float32) * INIT_SCALE
    w3 = jax.random.normal(k3, (DIM, INTER), jnp.float32) * INIT_SCALE

    ref = _reference(x, w1, w2, w3)

    # 1) f32 path: matches the reference tightly.
    out = feed_forward(x, w1, w2, w3)
    jax.block_until_ready(out)
    assert out.shape == (B, S, DIM) and out.dtype == jnp.float32
    assert bool(jnp.all(jnp.isfinite(out)))
    assert bool(jnp.allclose(out, ref, rtol=1e-5, atol=1e-6)), (
        float(jnp.max(jnp.abs(out - ref))))

    # 2) Tiled / ragged-M path (pad + trim, multi-step M grid): m = 15 rows.
    xr = jax.random.normal(kx, (3, 5, DIM), jnp.float32)
    out_r = feed_forward(xr, w1, w2, w3, block_m=8)
    jax.block_until_ready(out_r)
    assert out_r.shape == (3, 5, DIM)
    assert bool(jnp.allclose(out_r, _reference(xr, w1, w2, w3),
                             rtol=1e-5, atol=1e-6))

    # 3) bf16-weights path (production config for v6e/v7x bf16 MXU): looser tol.
    out_bf16 = feed_forward(x, w1, w2, w3, compute_dtype=jnp.bfloat16)
    jax.block_until_ready(out_bf16)
    assert out_bf16.shape == (B, S, DIM) and out_bf16.dtype == jnp.float32
    assert bool(jnp.allclose(out_bf16, ref, rtol=2e-2, atol=2e-2))

    print("KERNEL_OK")
</pallas_src>

<mosaic_0001>
module attributes {stable_mosaic.version = 11 : i64} {
  func.func @_ffn_kernel(%arg0: i32, %arg1: i32, %arg2: memref<16x32xf32, #tpu.memory_space<vmem>>, %arg3: memref<32x64xf32, #tpu.memory_space<vmem>>, %arg4: memref<32x64xf32, #tpu.memory_space<vmem>>, %arg5: memref<64x32xf32, #tpu.memory_space<vmem>>, %arg6: memref<16x32xf32, #tpu.memory_space<vmem>>, %arg7: memref<16x32xf32, #tpu.memory_space<vmem>>) attributes {dimension_semantics = [#tpu.dimension_semantics<parallel>, #tpu.dimension_semantics<arbitrary>], iteration_bounds = array<i64: 1, 1>, scalar_prefetch = 0 : i64, scratch_operands = 1 : i64, tpu.core_type = #tpu.core_type<tc>, window_params = [{transform_indices = @transform_0, window_bounds = array<i64: 16, 32>}, {transform_indices = @transform_1, window_bounds = array<i64: 32, 64>}, {transform_indices = @transform_2, window_bounds = array<i64: 32, 64>}, {transform_indices = @transform_3, window_bounds = array<i64: 64, 32>}, {transform_indices = @transform_4, window_bounds = array<i64: 16, 32>}]} {
    %c0_i32 = arith.constant 0 : i32
    %0 = arith.cmpi eq, %arg1, %c0_i32 : i32
    %1 = arith.extui %0 : i1 to i32
    %c0_i32_0 = arith.constant 0 : i32
    %2 = arith.cmpi ne, %1, %c0_i32_0 : i32
    scf.if %2 {
      %cst_17 = arith.constant 0.000000e+00 : f32
      %23 = vector.broadcast %cst_17 : f32 to vector<16x32xf32>
      %c0_18 = arith.constant 0 : index
      %c0_19 = arith.constant 0 : index
      %24 = vector.load %arg7[%c0_18, %c0_19] : memref<16x32xf32, #tpu.memory_space<vmem>>, vector<16x32xf32>
      tpu.vector_store %arg7[%c0_18, %c0_19], %23 {strides = array<i32>} : memref<16x32xf32, #tpu.memory_space<vmem>>, vector<16x32xf32>,
    } else {
    }
    %c0 = arith.constant 0 : index
    %c0_1 = arith.constant 0 : index
    %3 = vector.load %arg2[%c0, %c0_1] : memref<16x32xf32, #tpu.memory_space<vmem>>, vector<16x32xf32>
    %c0_2 = arith.constant 0 : index
    %c0_3 = arith.constant 0 : index
    %4 = vector.load %arg3[%c0_2, %c0_3] : memref<32x64xf32, #tpu.memory_space<vmem>>, vector<32x64xf32>
    %cst = arith.constant dense<0.000000e+00> : vector<16x64xf32>
    %5 = tpu.matmul %3, %4, %cst {dimension_numbers = #tpu.dot_dimension_numbers<[1], [0], [0], [1], [0, 0, 1, 1], [], []>} : vector<16x32xf32>, vector<32x64xf32>, vector<16x64xf32> -> vector<16x64xf32>
    %c0_4 = arith.constant 0 : index
    %c0_5 = arith.constant 0 : index
    %6 = vector.load %arg4[%c0_4, %c0_5] : memref<32x64xf32, #tpu.memory_space<vmem>>, vector<32x64xf32>
    %cst_6 = arith.constant dense<0.000000e+00> : vector<16x64xf32>
    %7 = tpu.matmul %3, %6, %cst_6 {dimension_numbers = #tpu.dot_dimension_numbers<[1], [0], [0], [1], [0, 0, 1, 1], [], []>} : vector<16x32xf32>, vector<32x64xf32>, vector<16x64xf32> -> vector<16x64xf32>
    %8 = arith.negf %5 : vector<16x64xf32>
    %9 = math.exp %8 : vector<16x64xf32>
    %cst_7 = arith.constant 1.000000e+00 : f32
    %10 = vector.broadcast %cst_7 : f32 to vector<16x64xf32>
    %11 = arith.addf %10, %9 : vector<16x64xf32>
    %12 = arith.divf %10, %11 : vector<16x64xf32>
    %13 = arith.mulf %5, %12 : vector<16x64xf32>
    %14 = arith.mulf %13, %7 : vector<16x64xf32>
    %c0_8 = arith.constant 0 : index
    %c0_9 = arith.constant 0 : index
    %15 = vector.load %arg7[%c0_8, %c0_9] : memref<16x32xf32, #tpu.memory_space<vmem>>, vector<16x32xf32>
    %c0_10 = arith.constant 0 : index
    %c0_11 = arith.constant 0 : index
    %16 = vector.load %arg5[%c0_10, %c0_11] : memref<64x32xf32, #tpu.memory_space<vmem>>, vector<64x32xf32>
    %cst_12 = arith.constant dense<0.000000e+00> : vector<16x32xf32>
    %17 = tpu.matmul %14, %16, %cst_12 {dimension_numbers = #tpu.dot_dimension_numbers<[1], [0], [0], [1], [0, 0, 1, 1], [], []>} : vector<16x64xf32>, vector<64x32xf32>, vector<16x32xf32> -> vector<16x32xf32>
    %18 = arith.addf %15, %17 : vector<16x32xf32>
    %c0_13 = arith.constant 0 : index
    %c0_14 = arith.constant 0 : index
    %19 = vector.load %arg7[%c0_13, %c0_14] : memref<16x32xf32, #tpu.memory_space<vmem>>, vector<16x32xf32>
    tpu.vector_store %arg7[%c0_13, %c0_14], %18 {strides = array<i32>} : memref<16x32xf32, #tpu.memory_space<vmem>>, vector<16x32xf32>,
    %c0_i32_15 = arith.constant 0 : i32
    %20 = arith.cmpi eq, %arg1, %c0_i32_15 : i32
    %21 = arith.extui %20 : i1 to i32
    %c0_i32_16 = arith.constant 0 : i32
    %22 = arith.cmpi ne, %21, %c0_i32_16 : i32
    scf.if %22 {
      %c0_17 = arith.constant 0 : index
      %c0_18 = arith.constant 0 : index
      %23 = vector.load %arg7[%c0_17, %c0_18] : memref<16x32xf32, #tpu.memory_space<vmem>>, vector<16x32xf32>
      %c0_19 = arith.constant 0 : index
      %c0_20 = arith.constant 0 : index
      %24 = vector.load %arg6[%c0_19, %c0_20] : memref<16x32xf32, #tpu.memory_space<vmem>>, vector<16x32xf32>
      tpu.vector_store %arg6[%c0_19, %c0_20], %23 {strides = array<i32>} : memref<16x32xf32, #tpu.memory_space<vmem>>, vector<16x32xf32>,
    } else {
    }
    return
  }
  func.func @transform_0(%arg0: i32, %arg1: i32) -> (i32, i32) {
    %c0_i32 = arith.constant 0 : i32
    %c0_i32_0 = arith.constant 0 : i32
    return %arg0, %c0_i32 : i32, i32
  }
  func.func @transform_1(%arg0: i32, %arg1: i32) -> (i32, i32) {
    %c0_i32 = arith.constant 0 : i32
    %c0_i32_0 = arith.constant 0 : i32
    return %c0_i32, %arg1 : i32, i32
  }
  func.func @transform_2(%arg0: i32, %arg1: i32) -> (i32, i32) {
    %c0_i32 = arith.constant 0 : i32
    %c0_i32_0 = arith.constant 0 : i32
    return %c0_i32, %arg1 : i32, i32
  }
  func.func @transform_3(%arg0: i32, %arg1: i32) -> (i32, i32) {
    %c0_i32 = arith.constant 0 : i32
    %c0_i32_0 = arith.constant 0 : i32
    return %arg1, %c0_i32 : i32, i32
  }
  func.func @transform_4(%arg0: i32, %arg1: i32) -> (i32, i32) {
    %c0_i32 = arith.constant 0 : i32
    %c0_i32_0 = arith.constant 0 : i32
    return %arg0, %c0_i32 : i32, i32
  }
}

</mosaic_0001>

<bundles_post_ra>
// kernel: tpu_custom_call.1
= control target key start
LH: loop header
LB: loop body
LE: loop exit
PB: predicated region body
PF: predicated region fallthrough
CT: control target
= control target key end

     0   :  { %vm22_vm0 = vcmask 261120   ;;  %s528_s0 = inlined_call_operand.vmem [shape: f32[16,32], index: 0, kind: input, shape index: {}]   ;;  %s529_s1 = inlined_call_operand.vmem [shape: f32[32,64], index: 1, kind: input, shape index: {}]   ;;  %s530_s2 = inlined_call_operand.vmem [shape: f32[32,64], index: 2, kind: input, shape index: {}]   ;;  %s531_s3 = inlined_call_operand.vmem [shape: f32[64,32], index: 3, kind: input, shape index: {}]   ;;  %s532_s4 = inlined_call_operand.hbm [shape: f32[16,32], index: 4, kind: output, shape index: {}]  }
   0x1   :  { %v30_v0 = vld [vmem:[%s529_s1 + $0x18] sm:$0xff]  ;;  %v29_v1 = vld [vmem:[%s529_s1 + $0x10] sm:$0xff]  ;;  %v25_v2 = vld [vmem:[%s528_s0] sm:$0xff] }
   0x2   :  { %357 = vmatprep.subr.mxu1 %v30_v0  ;;  %v28_v3 = vld [vmem:[%s529_s1 + $0x8] sm:$0xff]  ;;  %365 = vmatprep.mubr.msk.f32.mxu1 %vm22_vm0, %v25_v2 }
   0x3   :  { %358 = vmatpush3.msra.mxu1 %v30_v0 }
   0x4   :  { %359 = vmatprep.subr.mxu1 %v29_v1 }
   0x5   :  { %9 = vsyncpa [#allocation4], 0  ;;  %360 = vmatpush3.msra.mxu1 %v29_v1  ;;  %v27_v4 = vld [vmem:[%s529_s1] sm:$0xff]  ;;  %v26_v5 = vld [vmem:[%s528_s0 + $0x8] sm:$0xff]  ;;  %v432_v18 = vmov 0.0   ;;  %vm218_vm1 = vcmask 523264  }
   0x6   :  { %361 = vmatprep.subr.mxu1 %v28_v3  ;;  %v116_v6 = vld [vmem:[%s530_s2 + $0x18] sm:$0xff]  ;;  %v115_v7 = vld [vmem:[%s530_s2 + $0x10] sm:$0xff]  ;;  %v114_v8 = vld [vmem:[%s530_s2 + $0x8] sm:$0xff]  ;;  %24 = vst.msk [vmem:[#allocation2 + $0x8] sm:$0xff] %vm22_vm0, %v432_v18 }
   0x7   :  { %362 = vmatpush3.msra.mxu1 %v28_v3  ;;  %v113_v9 = vld [vmem:[%s530_s2] sm:$0xff]  ;;  %v217_v10 = vld [vmem:[%s531_s3 + $0x38] sm:$0xff]  ;;  %v216_v11 = vld [vmem:[%s531_s3 + $0x30] sm:$0xff]  ;;  %23 = vst.msk [vmem:[#allocation2] sm:$0xff] %vm22_vm0, %v432_v18 }
   0x8   :  { %363 = vmatprep.subr.mxu1 %v27_v4  ;;  %379 = vmatprep.subr.mxu0 %v217_v10  ;;  %v215_v12 = vld [vmem:[%s531_s3 + $0x28] sm:$0xff]  ;;  %v214_v13 = vld [vmem:[%s531_s3 + $0x20] sm:$0xff]  ;;  %v213_v14 = vld [vmem:[%s531_s3 + $0x18] sm:$0xff] }
   0x9   :  { %364 = vmatpush3.msra.mxu1 %v27_v4  ;;  %380 = vmatpush3.msra.mxu0 %v217_v10  ;;  %v212_v15 = vld [vmem:[%s531_s3 + $0x10] sm:$0xff]  ;;  %v211_v16 = vld [vmem:[%s531_s3 + $0x8] sm:$0xff]  ;;  %v210_v17 = vld [vmem:[%s531_s3] sm:$0xff]  ;;  %s433_s3 = smov [#allocation3]  }
   0xa   :  { %366 = vmatmul.mubr.msk.f32.vlgmr.msra.gmra.mxu1 %vm22_vm0, %v26_v5  ;;  %368 = vmatprep.subr.mxu1 %v116_v6  ;;  %s316_s22 = sshll.u32 %s433_s3, 4  ;;  %s317_s22 = int_to_ptr.vmem [resolvable:$true] %s316_s22 }
   0xb   :  { %369 = vmatpush3.msra.mxu1 %v116_v6  ;;  %376 = vmatprep.mubr.msk.f32.mxu1 %vm22_vm0, %v25_v2  ;;  %s410_s23 = scalar_lea.vmem %s317_s22, 256  ;;  %p415_p1 = scmp.lt.s32.totalorder %s317_s22, %s317_s22 }
   0xc   :  { %370 = vmatprep.subr.mxu1 %v115_v7  ;;  %381 = vmatprep.subr.mxu0 %v216_v11  ;;  %p411_p0 = scmp.ne.s32.totalorder %s317_s22, %s410_s23  ;;  %p416_p2 = scmp.lt.s32.totalorder %s410_s23, %s410_s23 }
   0xd   :  { %371 = vmatpush3.msra.mxu1 %v115_v7  ;;  %382 = vmatpush3.msra.mxu0 %v216_v11  ;;  %v209_v35 = vld [vmem:[#allocation2 + $0x8] sm:$0xff] }
   0xe   :  { %372 = vmatprep.subr.mxu1 %v114_v8  ;;  %383 = vmatprep.subr.mxu0 %v215_v12  ;;  %v208_v37 = vld [vmem:[#allocation2] sm:$0xff]  ;;  %p417_p3 = por %p416_p2, %p415_p1 }
   0xf   :  { %373 = vmatpush3.msra.mxu1 %v114_v8  ;;  %384 = vmatpush3.msra.mxu0 %v215_v12 }
  0x10   :  { %374 = vmatprep.subr.mxu1 %v113_v9  ;;  %385 = vmatprep.subr.mxu0 %v214_v13  ;;  %p418_p4 = pnand %p417_p3, %p411_p0 }
  0x11   :  { %375 = vmatpush3.msra.mxu1 %v113_v9  ;;  %386 = vmatpush3.msra.mxu0 %v214_v13 }
  0x12   :  { %377 = vmatmul.mubr.msk.f32.vlgmr.msra.gmra.mxu1 %vm22_vm0, %v26_v5  ;;  %387 = vmatprep.subr.mxu0 %v213_v14 }
  0x13   :  { %388 = vmatpush3.msra.mxu0 %v213_v14 }
  0x14   :  { %389 = vmatprep.subr.mxu0 %v212_v15 }
  0x15   :  { %390 = vmatpush3.msra.mxu0 %v212_v15 }
  0x16   :  { %391 = vmatprep.subr.mxu0 %v211_v16 }
  0x17   :  { %392 = vmatpush3.msra.mxu0 %v211_v16 }
  0x18   :  { %393 = vmatprep.subr.mxu0 %v210_v17 }
  0x19   :  { %394 = vmatpush3.msra.mxu0 %v210_v17 }
  0xca   :  { %v367_v19 = vpop.f32.mrf.mxu1 }
  0xcb   :  { %v332_v20 = vmul.f32 -1.442695, %v367_v19 }
  0xcc   :  { %v104_v21 = vpop.f32.mrf.mxu1 }
  0xcd   :  { %402 = vpow2.f32 %v332_v20  ;;  %v331_v22 = vmul.f32 -1.442695, %v104_v21 }
  0xcf   :  { %404 = vpow2.f32 %v331_v22 }
  0xd2   :  { %v378_v28 = vpop.f32.mrf.mxu1 }
  0xd4   :  { %v183_v32 = vpop.f32.mrf.mxu1 }
  0xda   :  { %v403_v23 = vpop.eup %402 }
  0xdb   :  { %v199_v24 = vadd.f32 1.0, %v403_v23 }
  0xdc   :  { %v405_v25 = vpop.eup %404 }
  0xdd   :  { %406 = vrcp.f32 %v199_v24  ;;  %v198_v26 = vadd.f32 1.0, %v405_v25 }
  0xdf   :  { %408 = vrcp.f32 %v198_v26 }
  0xea   :  { %v407_v27 = vpop.eup %406 }
  0xeb   :  { %v205_v30 = vmul.f32 %v407_v27, %v367_v19 }
  0xec   :  { %v409_v29 = vpop.eup %408 }
  0xed   :  { %v204_v31 = vmul.f32 %v409_v29, %v104_v21  ;;  %v207_v34 = vmul.f32 %v378_v28, %v205_v30 }
  0xef   :  { %v206_v33 = vmul.f32 %v204_v31, %v183_v32 }
  0xf1   :  { %395 = vmatprep.mubr.msk.f32.mxu0 %vm218_vm1, %v206_v33 }
  0xf2   :  { %396 = vmatmul.mubr.msk.f32.vlgmr.msra.gmra.mxu0 %vm218_vm1, %v207_v34 }
 0x1b2   :  { %v397_v36 = vpop.f32.mrf.mxu0 }
 0x1b3   :  { %v301_v38 = vadd.f32 %v397_v36, %v209_v35 }
 0x1b4   :  { %v291_v39 = vpop.f32.mrf.mxu0 }
 0x1b5   :  { %303 = vst.msk [vmem:[#allocation2 + $0x8] sm:$0xff] %vm22_vm0, %v301_v38  ;;  %v300_v40 = vadd.f32 %v291_v39, %v208_v37 }
 0x1b7   :  { %302 = vst.msk [vmem:[#allocation2] sm:$0xff] %vm22_vm0, %v300_v40 }
 0x1bc   :  { %v308_v41 = vld [vmem:[#allocation2 + $0x8] sm:$0xff] }
 0x1bd   :  { %310 = vst.msk [vmem:[#allocation3 + $0x8] sm:$0xff] %vm22_vm0, %v308_v41 }
 0x1be   :  { %v307_v42 = vld [vmem:[#allocation2] sm:$0xff] }
 0x1bf   :  { %309 = vst.msk [vmem:[#allocation3] sm:$0xff] %vm22_vm0, %v307_v42 }
 0x1c0   :  { %421 = shalt.err (!%p418_p4)
}
 0x1c1   :  { %s434_s24 = smov 128   ;;  %s435_s25 = smov 8  }
 0x1c2   :  { %322 = dma.vmem_to_hbm [thread:$0]  %s317_s22, 256, %s532_s4, [#allocation4], %s434_s24, %s434_s24, %s435_s25  }
 0x1c3   :  { %430 = dma.done.wait [#allocation4], 256  }
 0x1c4   :  { %431 = vsyncadd [#allocation4], 4294967040 }
 0x1c5   :  { %326 = vsyncpa [#allocation4], 1 }

</bundles_post_ra>
